<compile_context>
chip_gen: v6e
topology: v6e:2x2x1
jax: 0.10.0
libtpu: 0.0.40
codegen_flags: <defaults>
</compile_context>

<pallas_src>
import functools

import jax
import jax.numpy as jnp
from jax.experimental import pallas as pl
from jax.experimental.pallas import tpu as pltpu


def _round_up(x, m):
    return ((x + m - 1) // m) * m


def actor_kernel(s_ref, w1_ref, b1_ref, w2_ref, b2_ref, w3_ref, b3_ref, o_ref):
    """One batch tile: 3 matmuls (MXU, f32 accumulate) + ReLU + stable softmax."""
    mm_dtype = w1_ref.dtype  # bf16 on v6e/v7x if requested; f32 otherwise

    x = s_ref[...].astype(mm_dtype)
    h1 = jnp.dot(x, w1_ref[...], preferred_element_type=jnp.float32) + b1_ref[...]
    h1 = jnp.maximum(h1, 0.0)  # f32 elementwise (v5e has no bf16 VPU)

    h2 = jnp.dot(h1.astype(mm_dtype), w2_ref[...],
                 preferred_element_type=jnp.float32) + b2_ref[...]
    h2 = jnp.maximum(h2, 0.0)

    logits = jnp.dot(h2.astype(mm_dtype), w3_ref[...],
                     preferred_element_type=jnp.float32) + b3_ref[...]

    # Numerically-stable softmax along the lane axis. Padded action columns carry a
    # -1e30 bias, so exp underflows to exactly 0 and they drop out of the denominator.
    m = jnp.max(logits, axis=-1, keepdims=True)
    e = jnp.exp(logits - m)
    denom = jnp.sum(e, axis=-1, keepdims=True)
    # EUP approximate reciprocal + one Newton step (keeps error well below 1e-6 rel).
    r = pl.reciprocal(denom, approx=True)
    r = r * (2.0 - denom * r)
    o_ref[...] = (e * r).astype(o_ref.dtype)


def categorical_actor_forward(state, params, *, block_b=512, matmul_dtype=jnp.float32):
    """state: (B, state_dim) f32. params: dict of w1,b1,w2,b2,w3,b3 (f32, (in,out) weights).

    Returns softmax probabilities of shape (B, action_dim), f32.
    """
    w1, b1 = params["w1"], params["b1"]
    w2, b2 = params["w2"], params["b2"]
    w3, b3 = params["w3"], params["b3"]

    B, S = state.shape
    H = w1.shape[1]
    A = w3.shape[1]

    # --- lane-dense padding of feature dims -------------------------------------------
    Sp = _round_up(S, 128)
    Hp = _round_up(H, 128)
    Ap = _round_up(A, 128)

    # --- batch tiling ------------------------------------------------------------------
    TB = max(8, min(block_b, _round_up(B, 8)))   # multiple of 8 (f32 sublane)
    Bp = _round_up(B, TB)
    grid = (Bp // TB,)

    f32 = jnp.float32
    NEG = f32(-1e30)

    state_p = jnp.zeros((Bp, Sp), f32).at[:B, :S].set(state.astype(f32))
    w1_p = jnp.zeros((Sp, Hp), matmul_dtype).at[:S, :H].set(w1.astype(matmul_dtype))
    b1_p = jnp.zeros((1, Hp), f32).at[:, :H].set(b1.reshape(1, H).astype(f32))
    w2_p = jnp.zeros((Hp, Hp), matmul_dtype).at[:H, :H].set(w2.astype(matmul_dtype))
    b2_p = jnp.zeros((1, Hp), f32).at[:, :H].set(b2.reshape(1, H).astype(f32))
    w3_p = jnp.zeros((Hp, Ap), matmul_dtype).at[:H, :A].set(w3.astype(matmul_dtype))
    # Padded action columns get a huge negative bias -> softmax gives them exactly 0.
    b3_p = jnp.full((1, Ap), NEG, f32).at[:, :A].set(b3.reshape(1, A).astype(f32))

    # --- VMEM budget (sized for v7x's 64 MiB physical; cap below it with headroom) ------
    wbytes = jnp.dtype(matmul_dtype).itemsize
    weight_bytes = (Sp * Hp + Hp * Hp + Hp * Ap) * wbytes + (2 * Hp + Ap) * 4
    io_bytes = TB * (Sp + Ap) * 4            # one state tile + one output tile
    interm_bytes = 4 * TB * Hp * 4           # rough headroom for f32 intermediates
    est = 2 * int(weight_bytes) + 2 * int(io_bytes) + int(interm_bytes)  # 2x: double buffers
    vmem_limit = min(max(est + (4 << 20), 16 << 20), 48 << 20)

    cost = pl.CostEstimate(
        flops=int(2 * Bp * (Sp * Hp + Hp * Hp + Hp * Ap)),
        transcendentals=int(Bp * Ap),
        bytes_accessed=int(state_p.size * 4 + w1_p.size * wbytes + w2_p.size * wbytes
                           + w3_p.size * wbytes + (2 * Hp + Ap) * 4 + Bp * Ap * 4),
    )

    out_p = pl.pallas_call(
        actor_kernel,
        out_shape=jax.ShapeDtypeStruct((Bp, Ap), f32),
        grid=grid,
        in_specs=[
            pl.BlockSpec((TB, Sp), lambda i: (i, 0)),   # state tile moves with the grid
            pl.BlockSpec((Sp, Hp), lambda i: (0, 0)),   # weights: constant index_map ->
            pl.BlockSpec((1, Hp), lambda i: (0, 0)),    #   VMEM-resident, fetched once
            pl.BlockSpec((Hp, Hp), lambda i: (0, 0)),
            pl.BlockSpec((1, Hp), lambda i: (0, 0)),
            pl.BlockSpec((Hp, Ap), lambda i: (0, 0)),
            pl.BlockSpec((1, Ap), lambda i: (0, 0)),
        ],
        out_specs=pl.BlockSpec((TB, Ap), lambda i: (i, 0)),
        compiler_params=pltpu.CompilerParams(
            dimension_semantics=("parallel",),          # shards batch across TCs on v7x
            vmem_limit_bytes=vmem_limit,
        ),
        cost_estimate=cost,
    )(state_p, w1_p, b1_p, w2_p, b2_p, w3_p, b3_p)

    return out_p[:B, :A]


def xavier_uniform(key, fan_in, fan_out, dtype=jnp.float32):
    # torch.nn.init.xavier_uniform_ with gain=1: U(-a, a), a = sqrt(6/(fan_in+fan_out))
    limit = (6.0 / (fan_in + fan_out)) ** 0.5
    # Stored as (in, out) so forward is x @ W (same math as torch's x @ W.T).
    return jax.random.uniform(key, (fan_in, fan_out), dtype, minval=-limit, maxval=limit)


def init_params(key, state_dim, hidden_dim, action_dim):
    k1, k2, k3 = jax.random.split(key, 3)
    return {
        "w1": xavier_uniform(k1, state_dim, hidden_dim),
        "b1": jnp.zeros((1, hidden_dim), jnp.float32),
        "w2": xavier_uniform(k2, hidden_dim, hidden_dim),
        "b2": jnp.zeros((1, hidden_dim), jnp.float32),
        "w3": xavier_uniform(k3, hidden_dim, action_dim),
        "b3": jnp.zeros((1, action_dim), jnp.float32),
    }


def reference_forward(state, params):
    h1 = jnp.maximum(state @ params["w1"] + params["b1"], 0.0)
    h2 = jnp.maximum(h1 @ params["w2"] + params["b2"], 0.0)
    logits = h2 @ params["w3"] + params["b3"]
    return jax.nn.softmax(logits, axis=-1)


if __name__ == "__main__":
    key = jax.random.PRNGKey(0)
    k_params, k_state = jax.random.split(key)

    batch, state_dim, hidden_dim, action_dim = 8, 16, 32, 8
    params = init_params(k_params, state_dim, hidden_dim, action_dim)
    state = jax.random.normal(k_state, (batch, state_dim), jnp.float32)

    ref = reference_forward(state, params)

    # f32 matmuls: bit-tight check.
    prob = categorical_actor_forward(state, params, matmul_dtype=jnp.float32)
    prob = jax.block_until_ready(prob)
    assert prob.shape == (batch, action_dim)
    assert jnp.allclose(jnp.sum(prob, axis=-1), 1.0, atol=1e-5)
    assert jnp.allclose(prob, ref, atol=1e-5, rtol=1e-5)

    # bf16 matmul operands (v6e/v7x MXU-native path): looser check against f32 reference.
    prob_bf16 = categorical_actor_forward(state, params, matmul_dtype=jnp.bfloat16)
    prob_bf16 = jax.block_until_ready(prob_bf16)
    assert prob_bf16.shape == (batch, action_dim)
    assert jnp.allclose(jnp.sum(prob_bf16, axis=-1), 1.0, atol=1e-3)
    assert jnp.allclose(prob_bf16, ref, atol=3e-2, rtol=3e-2)

    print("KERNEL_OK")
</pallas_src>

<mosaic_0001>
module attributes {stable_mosaic.version = 11 : i64} {
  func.func @actor_kernel(%arg0: i32, %arg1: memref<8x128xf32, #tpu.memory_space<vmem>>, %arg2: memref<128x128xf32, #tpu.memory_space<vmem>>, %arg3: memref<1x128xf32, #tpu.memory_space<vmem>>, %arg4: memref<128x128xf32, #tpu.memory_space<vmem>>, %arg5: memref<1x128xf32, #tpu.memory_space<vmem>>, %arg6: memref<128x128xf32, #tpu.memory_space<vmem>>, %arg7: memref<1x128xf32, #tpu.memory_space<vmem>>, %arg8: memref<8x128xf32, #tpu.memory_space<vmem>>) attributes {dimension_semantics = [#tpu.dimension_semantics<parallel>], iteration_bounds = array<i64: 1>, scalar_prefetch = 0 : i64, scratch_operands = 0 : i64, tpu.core_type = #tpu.core_type<tc>, window_params = [{transform_indices = @transform_0, window_bounds = array<i64: 8, 128>}, {pipeline_mode = #tpu.pipeline_mode<synchronous>, transform_indices = @transform_1, window_bounds = array<i64: 128, 128>}, {pipeline_mode = #tpu.pipeline_mode<synchronous>, transform_indices = @transform_2, window_bounds = array<i64: 1, 128>}, {pipeline_mode = #tpu.pipeline_mode<synchronous>, transform_indices = @transform_3, window_bounds = array<i64: 128, 128>}, {pipeline_mode = #tpu.pipeline_mode<synchronous>, transform_indices = @transform_4, window_bounds = array<i64: 1, 128>}, {pipeline_mode = #tpu.pipeline_mode<synchronous>, transform_indices = @transform_5, window_bounds = array<i64: 128, 128>}, {pipeline_mode = #tpu.pipeline_mode<synchronous>, transform_indices = @transform_6, window_bounds = array<i64: 1, 128>}, {transform_indices = @transform_7, window_bounds = array<i64: 8, 128>}]} {
    %c0 = arith.constant 0 : index
    %c0_0 = arith.constant 0 : index
    %0 = vector.load %arg1[%c0, %c0_0] : memref<8x128xf32, #tpu.memory_space<vmem>>, vector<8x128xf32>
    %c0_1 = arith.constant 0 : index
    %c0_2 = arith.constant 0 : index
    %1 = vector.load %arg2[%c0_1, %c0_2] : memref<128x128xf32, #tpu.memory_space<vmem>>, vector<128x128xf32>
    %cst = arith.constant dense<0.000000e+00> : vector<8x128xf32>
    %2 = tpu.matmul %0, %1, %cst {dimension_numbers = #tpu.dot_dimension_numbers<[1], [0], [0], [1], [0, 0, 1, 1], [], []>} : vector<8x128xf32>, vector<128x128xf32>, vector<8x128xf32> -> vector<8x128xf32>
    %c0_3 = arith.constant 0 : index
    %c0_4 = arith.constant 0 : index
    %3 = vector.load %arg3[%c0_3, %c0_4] : memref<1x128xf32, #tpu.memory_space<vmem>>, vector<1x128xf32>
    %4 = vector.broadcast %3 : vector<1x128xf32> to vector<8x128xf32>
    %5 = arith.addf %2, %4 : vector<8x128xf32>
    %cst_5 = arith.constant 0.000000e+00 : f32
    %6 = vector.broadcast %cst_5 : f32 to vector<8x128xf32>
    %7 = arith.maximumf %5, %6 : vector<8x128xf32>
    %c0_6 = arith.constant 0 : index
    %c0_7 = arith.constant 0 : index
    %8 = vector.load %arg4[%c0_6, %c0_7] : memref<128x128xf32, #tpu.memory_space<vmem>>, vector<128x128xf32>
    %cst_8 = arith.constant dense<0.000000e+00> : vector<8x128xf32>
    %9 = tpu.matmul %7, %8, %cst_8 {dimension_numbers = #tpu.dot_dimension_numbers<[1], [0], [0], [1], [0, 0, 1, 1], [], []>} : vector<8x128xf32>, vector<128x128xf32>, vector<8x128xf32> -> vector<8x128xf32>
    %c0_9 = arith.constant 0 : index
    %c0_10 = arith.constant 0 : index
    %10 = vector.load %arg5[%c0_9, %c0_10] : memref<1x128xf32, #tpu.memory_space<vmem>>, vector<1x128xf32>
    %11 = vector.broadcast %10 : vector<1x128xf32> to vector<8x128xf32>
    %12 = arith.addf %9, %11 : vector<8x128xf32>
    %cst_11 = arith.constant 0.000000e+00 : f32
    %13 = vector.broadcast %cst_11 : f32 to vector<8x128xf32>
    %14 = arith.maximumf %12, %13 : vector<8x128xf32>
    %c0_12 = arith.constant 0 : index
    %c0_13 = arith.constant 0 : index
    %15 = vector.load %arg6[%c0_12, %c0_13] : memref<128x128xf32, #tpu.memory_space<vmem>>, vector<128x128xf32>
    %cst_14 = arith.constant dense<0.000000e+00> : vector<8x128xf32>
    %16 = tpu.matmul %14, %15, %cst_14 {dimension_numbers = #tpu.dot_dimension_numbers<[1], [0], [0], [1], [0, 0, 1, 1], [], []>} : vector<8x128xf32>, vector<128x128xf32>, vector<8x128xf32> -> vector<8x128xf32>
    %c0_15 = arith.constant 0 : index
    %c0_16 = arith.constant 0 : index
    %17 = vector.load %arg7[%c0_15, %c0_16] : memref<1x128xf32, #tpu.memory_space<vmem>>, vector<1x128xf32>
    %18 = vector.broadcast %17 : vector<1x128xf32> to vector<8x128xf32>
    %19 = arith.addf %16, %18 : vector<8x128xf32>
    %cst_17 = arith.constant dense<0xFF800000> : vector<8xf32>
    %20 = vector.multi_reduction <maximumf>, %19, %cst_17 [1] : vector<8x128xf32> to vector<8xf32>
    %21 = vector.shape_cast %20 : vector<8xf32> to vector<8x1xf32>
    %22 = vector.broadcast %21 : vector<8x1xf32> to vector<8x128xf32>
    %23 = arith.subf %19, %22 : vector<8x128xf32>
    %24 = math.exp %23 : vector<8x128xf32>
    %cst_18 = arith.constant dense<0.000000e+00> : vector<8xf32>
    %25 = vector.multi_reduction <add>, %24, %cst_18 [1] : vector<8x128xf32> to vector<8xf32>
    %26 = vector.shape_cast %25 : vector<8xf32> to vector<8x1xf32>
    %27 = tpu.reciprocal %26 {approx = true} : vector<8x1xf32> -> vector<8x1xf32>
    %28 = arith.mulf %26, %27 : vector<8x1xf32>
    %cst_19 = arith.constant 2.000000e+00 : f32
    %29 = vector.broadcast %cst_19 : f32 to vector<8x1xf32>
    %30 = arith.subf %29, %28 : vector<8x1xf32>
    %31 = arith.mulf %27, %30 : vector<8x1xf32>
    %32 = vector.broadcast %31 : vector<8x1xf32> to vector<8x128xf32>
    %33 = arith.mulf %24, %32 : vector<8x128xf32>
    %c0_20 = arith.constant 0 : index
    %c0_21 = arith.constant 0 : index
    %34 = vector.load %arg8[%c0_20, %c0_21] : memref<8x128xf32, #tpu.memory_space<vmem>>, vector<8x128xf32>
    tpu.vector_store %arg8[%c0_20, %c0_21], %33 {strides = array<i32>} : memref<8x128xf32, #tpu.memory_space<vmem>>, vector<8x128xf32>,
    return
  }
  func.func @transform_0(%arg0: i32) -> (i32, i32) {
    %c0_i32 = arith.constant 0 : i32
    %c0_i32_0 = arith.constant 0 : i32
    return %arg0, %c0_i32 : i32, i32
  }
  func.func @transform_1(%arg0: i32) -> (i32, i32) {
    %c0_i32 = arith.constant 0 : i32
    %c0_i32_0 = arith.constant 0 : i32
    %c0_i32_1 = arith.constant 0 : i32
    return %c0_i32, %c0_i32_0 : i32, i32
  }
  func.func @transform_2(%arg0: i32) -> (i32, i32) {
    %c0_i32 = arith.constant 0 : i32
    %c0_i32_0 = arith.constant 0 : i32
    %c0_i32_1 = arith.constant 0 : i32
    return %c0_i32, %c0_i32_0 : i32, i32
  }
  func.func @transform_3(%arg0: i32) -> (i32, i32) {
    %c0_i32 = arith.constant 0 : i32
    %c0_i32_0 = arith.constant 0 : i32
    %c0_i32_1 = arith.constant 0 : i32
    return %c0_i32, %c0_i32_0 : i32, i32
  }
  func.func @transform_4(%arg0: i32) -> (i32, i32) {
    %c0_i32 = arith.constant 0 : i32
    %c0_i32_0 = arith.constant 0 : i32
    %c0_i32_1 = arith.constant 0 : i32
    return %c0_i32, %c0_i32_0 : i32, i32
  }
  func.func @transform_5(%arg0: i32) -> (i32, i32) {
    %c0_i32 = arith.constant 0 : i32
    %c0_i32_0 = arith.constant 0 : i32
    %c0_i32_1 = arith.constant 0 : i32
    return %c0_i32, %c0_i32_0 : i32, i32
  }
  func.func @transform_6(%arg0: i32) -> (i32, i32) {
    %c0_i32 = arith.constant 0 : i32
    %c0_i32_0 = arith.constant 0 : i32
    %c0_i32_1 = arith.constant 0 : i32
    return %c0_i32, %c0_i32_0 : i32, i32
  }
  func.func @transform_7(%arg0: i32) -> (i32, i32) {
    %c0_i32 = arith.constant 0 : i32
    %c0_i32_0 = arith.constant 0 : i32
    return %arg0, %c0_i32 : i32, i32
  }
}

</mosaic_0001>

<bundles_post_ra>
// kernel: tpu_custom_call.1
= control target key start
LH: loop header
LB: loop body
LE: loop exit
PB: predicated region body
PF: predicated region fallthrough
CT: control target
= control target key end

     0   :  { %12 = vsyncpa [#allocation3], 0  ;;  %s808_s0 = inlined_call_operand.hbm [shape: f32[8,128], index: 0, kind: input, shape index: {}]   ;;  %s809_s1 = inlined_call_operand.hbm [shape: f32[128,128], index: 1, kind: input, shape index: {}]   ;;  %s810_s2 = inlined_call_operand.vmem [shape: f32[1,128], index: 2, kind: input, shape index: {}]   ;;  %s811_s3 = inlined_call_operand.hbm [shape: f32[128,128], index: 3, kind: input, shape index: {}]   ;;  %s812_s4 = inlined_call_operand.vmem [shape: f32[1,128], index: 4, kind: input, shape index: {}]   ;;  %s813_s5 = inlined_call_operand.hbm [shape: f32[128,128], index: 5, kind: input, shape index: {}]   ;;  %s814_s6 = inlined_call_operand.vmem [shape: f32[1,128], index: 6, kind: input, shape index: {}]   ;;  %s815_s7 = inlined_call_operand.hbm [shape: f32[8,128], index: 7, kind: output, shape index: {}]  }
   0x1   :  { %13 = vsyncpa [#allocation6], 0 }
   0x2   :  { %14 = vsyncpa [#allocation9], 0 }
   0x3   :  { %15 = vsyncpa [#allocation4], 0  ;;  %s672_s24 = smov [#allocation5]  }
   0x4   :  { %s31_s25 = sshll.u32 %s672_s24, 4  ;;  %s32_s25 = int_to_ptr.vmem [resolvable:$true] %s31_s25 }
   0x5   :  { %s572_s26 = scalar_lea.vmem %s32_s25, 2048  ;;  %p577_p1 = scmp.lt.s32.totalorder %s32_s25, %s32_s25 }
   0x6   :  { %p573_p0 = scmp.ne.s32.totalorder %s32_s25, %s572_s26  ;;  %p578_p2 = scmp.lt.s32.totalorder %s572_s26, %s572_s26 }
   0x8   :  { %p579_p3 = por %p578_p2, %p577_p1 }
   0xa   :  { %p580_p4 = pnand %p579_p3, %p573_p0 }
   0xc   :  { %583 = shalt.err (!%p580_p4)
}
   0xd   :  { %s673_s27 = smov 128   ;;  %s674_s28 = smov 8  }
   0xe   :  { %37 = dma.hbm_to_vmem [thread:$0]  %s809_s1, 2048, %s32_s25, [#allocation6], %s673_s27, %s673_s27, %s674_s28  }
   0xf   :  { %s675_s8 = smov [#allocation2]   ;;  %s676_s10 = smov [#allocation7]  }
  0x10   :  { %s22_s9 = sshll.u32 %s675_s8, 4  ;;  %s45_s11 = sshll.u32 %s676_s10, 4  ;;  %s23_s9 = int_to_ptr.vmem [resolvable:$true] %s22_s9  ;;  %s46_s11 = int_to_ptr.vmem [resolvable:$true] %s45_s11 }
  0x11   :  { %s592_s12 = scalar_lea.vmem %s23_s9, 128  ;;  %p597_p6 = scmp.lt.s32.totalorder %s23_s9, %s23_s9 }
  0x12   :  { %p593_p5 = scmp.ne.s32.totalorder %s23_s9, %s592_s12  ;;  %p598_p7 = scmp.lt.s32.totalorder %s592_s12, %s592_s12 }
  0x14   :  { %p599_p8 = por %p598_p7, %p597_p6 }
  0x16   :  { %p600_p9 = pnand %p599_p8, %p593_p5 }
  0x18   :  { %603 = shalt.err (!%p600_p9)
}
  0x19   :  { %25 = dma.hbm_to_vmem [thread:$0]  %s808_s0, 128, %s23_s9, [#allocation3]  }
  0x1a   :  { %s612_s15 = scalar_lea.vmem %s46_s11, 2048  ;;  %p617_p11 = scmp.lt.s32.totalorder %s46_s11, %s46_s11 }
  0x1b   :  { %p613_p10 = scmp.ne.s32.totalorder %s46_s11, %s612_s15  ;;  %p618_p12 = scmp.lt.s32.totalorder %s612_s15, %s612_s15 }
  0x1d   :  { %p619_p13 = por %p618_p12, %p617_p11 }
  0x1f   :  { %p620_p0 = pnand %p619_p13, %p613_p10 }
  0x21   :  { %623 = shalt.err (!%p620_p0)
}
  0x22   :  { %51 = dma.hbm_to_vmem [thread:$0]  %s811_s3, 2048, %s46_s11, [#allocation6], %s673_s27, %s673_s27, %s674_s28  }
  0x23   :  { %s677_s17 = smov [#allocation8]  }
  0x24   :  { %s59_s18 = sshll.u32 %s677_s17, 4  ;;  %s60_s18 = int_to_ptr.vmem [resolvable:$true] %s59_s18 }
  0x25   :  { %s632_s19 = scalar_lea.vmem %s60_s18, 2048  ;;  %p637_p2 = scmp.lt.s32.totalorder %s60_s18, %s60_s18 }
  0x26   :  { %p633_p1 = scmp.ne.s32.totalorder %s60_s18, %s632_s19  ;;  %p638_p3 = scmp.lt.s32.totalorder %s632_s19, %s632_s19 }
  0x28   :  { %p639_p4 = por %p638_p3, %p637_p2 }
  0x2a   :  { %p640_p5 = pnand %p639_p4, %p633_p1 }
  0x2c   :  { %643 = shalt.err (!%p640_p5)
}
  0x2d   :  { %65 = dma.hbm_to_vmem [thread:$0]  %s813_s5, 2048, %s60_s18, [#allocation9], %s673_s27, %s673_s27, %s674_s28  }
  0x2e   :  { %664 = dma.done.wait [#allocation3], 128  }
  0x2f   :  { %665 = vsyncadd [#allocation3], 4294967168 }
  0x30   :  { %666 = dma.done.wait [#allocation6], 4096  }
  0x31   :  { %667 = vsyncadd [#allocation6], 4294963200 }
  0x32   :  { %668 = dma.done.wait [#allocation9], 2048  }
  0x33   :  { %669 = vsyncadd [#allocation9], 4294965248  ;;  %v678_v0 = vmov 0.0   ;;  %vm679_vm0 = vmmov 0   ;;  %v96_v1 = vld [vmem:[#allocation5 + $0x78] sm:$0xff]  ;;  %v95_v2 = vld [vmem:[#allocation5 + $0x70] sm:$0xff] }
  0x34   :  { %446 = vmatprep.subr.mxu0 %v678_v0  ;;  %478 = vmatprep.mubr.msk.f32.mxu0 %vm679_vm0, %v678_v0  ;;  %v94_v3 = vld [vmem:[#allocation5 + $0x68] sm:$0xff]  ;;  %v93_v4 = vld [vmem:[#allocation5 + $0x60] sm:$0xff]  ;;  %v190_v5 = vld [vmem:[#allocation7 + $0x78] sm:$0xff] }
  0x35   :  { %481 = vmatprep.subr.mxu1 %v678_v0  ;;  %513 = vmatprep.mubr.msk.f32.mxu1 %vm679_vm0, %v678_v0  ;;  %v92_v6 = vld [vmem:[#allocation5 + $0x58] sm:$0xff]  ;;  %v189_v7 = vld [vmem:[#allocation7 + $0x70] sm:$0xff]  ;;  %v188_v8 = vld [vmem:[#allocation7 + $0x68] sm:$0xff] }
  0x36   :  { %447 = vmatpush3.msra.mxu0 %v96_v1  ;;  %482 = vmatpush3.msra.mxu1 %v190_v5  ;;  %v91_v9 = vld [vmem:[#allocation5 + $0x50] sm:$0xff]  ;;  %v187_v10 = vld [vmem:[#allocation7 + $0x60] sm:$0xff]  ;;  %v90_v11 = vld [vmem:[#allocation5 + $0x48] sm:$0xff] }
  0x37   :  { %448 = vmatprep.subr.mxu0 %v678_v0  ;;  %483 = vmatprep.subr.mxu1 %v678_v0  ;;  %v186_v12 = vld [vmem:[#allocation7 + $0x58] sm:$0xff]  ;;  %v89_v13 = vld [vmem:[#allocation5 + $0x40] sm:$0xff]  ;;  %v185_v14 = vld [vmem:[#allocation7 + $0x50] sm:$0xff] }
  0x38   :  { %449 = vmatpush3.msra.mxu0 %v95_v2  ;;  %484 = vmatpush3.msra.mxu1 %v189_v7  ;;  %v88_v15 = vld [vmem:[#allocation5 + $0x38] sm:$0xff]  ;;  %v184_v16 = vld [vmem:[#allocation7 + $0x48] sm:$0xff]  ;;  %v87_v17 = vld [vmem:[#allocation5 + $0x30] sm:$0xff] }
  0x39   :  { %450 = vmatprep.subr.mxu0 %v678_v0  ;;  %485 = vmatprep.subr.mxu1 %v678_v0  ;;  %v183_v18 = vld [vmem:[#allocation7 + $0x40] sm:$0xff]  ;;  %v86_v19 = vld [vmem:[#allocation5 + $0x28] sm:$0xff]  ;;  %v182_v20 = vld [vmem:[#allocation7 + $0x38] sm:$0xff] }
  0x3a   :  { %451 = vmatpush3.msra.mxu0 %v94_v3  ;;  %486 = vmatpush3.msra.mxu1 %v188_v8  ;;  %v85_v21 = vld [vmem:[#allocation5 + $0x20] sm:$0xff]  ;;  %v181_v22 = vld [vmem:[#allocation7 + $0x30] sm:$0xff]  ;;  %v84_v23 = vld [vmem:[#allocation5 + $0x18] sm:$0xff] }
  0x3b   :  { %452 = vmatprep.subr.mxu0 %v678_v0  ;;  %487 = vmatprep.subr.mxu1 %v678_v0  ;;  %v180_v24 = vld [vmem:[#allocation7 + $0x28] sm:$0xff]  ;;  %v83_v25 = vld [vmem:[#allocation5 + $0x10] sm:$0xff]  ;;  %v179_v26 = vld [vmem:[#allocation7 + $0x20] sm:$0xff] }
  0x3c   :  { %453 = vmatpush3.msra.mxu0 %v93_v4  ;;  %488 = vmatpush3.msra.mxu1 %v187_v10  ;;  %v82_v27 = vld [vmem:[#allocation5 + $0x8] sm:$0xff]  ;;  %v178_v28 = vld [vmem:[#allocation7 + $0x18] sm:$0xff]  ;;  %v81_v29 = vld [vmem:[#allocation5] sm:$0xff] }
  0x3d   :  { %454 = vmatprep.subr.mxu0 %v678_v0  ;;  %489 = vmatprep.subr.mxu1 %v678_v0  ;;  %v80_v30 = vld [vmem:[#allocation2] sm:$0xff]  ;;  %v177_v31 = vld [vmem:[#allocation7 + $0x10] sm:$0xff]  ;;  %v176_v32 = vld [vmem:[#allocation7 + $0x8] sm:$0xff] }
  0x3e   :  { %455 = vmatpush3.msra.mxu0 %v92_v6  ;;  %490 = vmatpush3.msra.mxu1 %v186_v12  ;;  %v175_v33 = vld [vmem:[#allocation7] sm:$0xff]  ;;  %v284_v34 = vld [vmem:[#allocation8 + $0x78] sm:$0xff]  ;;  %v283_v35 = vld [vmem:[#allocation8 + $0x70] sm:$0xff] }
  0x3f   :  { %456 = vmatprep.subr.mxu0 %v678_v0  ;;  %491 = vmatprep.subr.mxu1 %v678_v0  ;;  %v282_v36 = vld [vmem:[#allocation8 + $0x68] sm:$0xff]  ;;  %v281_v37 = vld [vmem:[#allocation8 + $0x60] sm:$0xff]  ;;  %v280_v38 = vld [vmem:[#allocation8 + $0x58] sm:$0xff] }
  0x40   :  { %457 = vmatpush3.msra.mxu0 %v91_v9  ;;  %492 = vmatpush3.msra.mxu1 %v185_v14  ;;  %v279_v39 = vld [vmem:[#allocation8 + $0x50] sm:$0xff]  ;;  %v278_v40 = vld [vmem:[#allocation8 + $0x48] sm:$0xff]  ;;  %v277_v41 = vld [vmem:[#allocation8 + $0x40] sm:$0xff] }
  0x41   :  { %458 = vmatprep.subr.mxu0 %v678_v0  ;;  %493 = vmatprep.subr.mxu1 %v678_v0  ;;  %v276_v42 = vld [vmem:[#allocation8 + $0x38] sm:$0xff]  ;;  %v275_v43 = vld [vmem:[#allocation8 + $0x30] sm:$0xff]  ;;  %v274_v44 = vld [vmem:[#allocation8 + $0x28] sm:$0xff] }
  0x42   :  { %459 = vmatpush3.msra.mxu0 %v90_v11  ;;  %494 = vmatpush3.msra.mxu1 %v184_v16  ;;  %v273_v45 = vld [vmem:[#allocation8 + $0x20] sm:$0xff]  ;;  %v272_v46 = vld [vmem:[#allocation8 + $0x18] sm:$0xff]  ;;  %v271_v52 = vld [vmem:[#allocation8 + $0x10] sm:$0xff] }
  0x43   :  { %460 = vmatprep.subr.mxu0 %v678_v0  ;;  %495 = vmatprep.subr.mxu1 %v678_v0  ;;  %v392_v47 = vld [vmem:[%s810_s2] ss:$0 sm:$0xff]  ;;  %v270_v53 = vld [vmem:[#allocation8 + $0x8] sm:$0xff]  ;;  %v269_v54 = vld [vmem:[#allocation8] sm:$0xff] }
  0x44   :  { %461 = vmatpush3.msra.mxu0 %v89_v13  ;;  %496 = vmatpush3.msra.mxu1 %v183_v18  ;;  %v393_v55 = vld [vmem:[%s812_s4] ss:$0 sm:$0xff]  ;;  %s680_s4 = smov [#allocation10]  }
  0x45   :  { %462 = vmatprep.subr.mxu0 %v678_v0  ;;  %497 = vmatprep.subr.mxu1 %v678_v0  ;;  %v394_v60 = vld [vmem:[%s814_s6] ss:$0 sm:$0xff]  ;;  %s381_s24 = sshll.u32 %s680_s4, 4  ;;  %s382_s24 = int_to_ptr.vmem [resolvable:$true] %s381_s24 }
  0x46   :  { %463 = vmatpush3.msra.mxu0 %v88_v15  ;;  %498 = vmatpush3.msra.mxu1 %v182_v20  ;;  %s644_s6 = scalar_lea.vmem %s382_s24, 128  ;;  %p649_p7 = scmp.lt.s32.totalorder %s382_s24, %s382_s24 }
  0x47   :  { %464 = vmatprep.subr.mxu0 %v678_v0  ;;  %499 = vmatprep.subr.mxu1 %v678_v0  ;;  %p645_p6 = scmp.ne.s32.totalorder %s382_s24, %s644_s6  ;;  %p650_p8 = scmp.lt.s32.totalorder %s644_s6, %s644_s6 }
  0x48   :  { %465 = vmatpush3.msra.mxu0 %v87_v17  ;;  %500 = vmatpush3.msra.mxu1 %v181_v22 }
  0x49   :  { %466 = vmatprep.subr.mxu0 %v678_v0  ;;  %501 = vmatprep.subr.mxu1 %v678_v0  ;;  %p651_p9 = por %p650_p8, %p649_p7 }
  0x4a   :  { %467 = vmatpush3.msra.mxu0 %v86_v19  ;;  %502 = vmatpush3.msra.mxu1 %v180_v24 }
  0x4b   :  { %468 = vmatprep.subr.mxu0 %v678_v0  ;;  %503 = vmatprep.subr.mxu1 %v678_v0  ;;  %p652_p10 = pnand %p651_p9, %p645_p6 }
  0x4c   :  { %469 = vmatpush3.msra.mxu0 %v85_v21  ;;  %504 = vmatpush3.msra.mxu1 %v179_v26 }
  0x4d   :  { %470 = vmatprep.subr.mxu0 %v678_v0  ;;  %505 = vmatprep.subr.mxu1 %v678_v0 }
  0x4e   :  { %471 = vmatpush3.msra.mxu0 %v84_v23  ;;  %506 = vmatpush3.msra.mxu1 %v178_v28 }
  0x4f   :  { %472 = vmatprep.subr.mxu0 %v678_v0  ;;  %507 = vmatprep.subr.mxu1 %v678_v0 }
  0x50   :  { %473 = vmatpush3.msra.mxu0 %v83_v25  ;;  %508 = vmatpush3.msra.mxu1 %v177_v31 }
  0x51   :  { %474 = vmatprep.subr.mxu0 %v678_v0  ;;  %509 = vmatprep.subr.mxu1 %v678_v0 }
  0x52   :  { %475 = vmatpush3.msra.mxu0 %v82_v27  ;;  %510 = vmatpush3.msra.mxu1 %v176_v32 }
  0x53   :  { %476 = vmatprep.subr.mxu0 %v678_v0  ;;  %511 = vmatprep.subr.mxu1 %v678_v0 }
  0x54   :  { %477 = vmatpush3.msra.mxu0 %v81_v29  ;;  %512 = vmatpush3.msra.mxu1 %v175_v33 }
  0x55   :  { %479 = vmatmul.mubr.f32.vlgmr.msra.gmra.mxu0 %v80_v30  ;;  %516 = vmatprep.subr.mxu0 %v678_v0 }
  0x56   :  { %548 = vmatprep.mubr.msk.f32.mxu0 %vm679_vm0, %v678_v0  ;;  %517 = vmatpush3.msra.mxu0 %v284_v34 }
  0x57   :  { %518 = vmatprep.subr.mxu0 %v678_v0 }
  0x58   :  { %519 = vmatpush3.msra.mxu0 %v283_v35 }
  0x59   :  { %520 = vmatprep.subr.mxu0 %v678_v0 }
  0x5a   :  { %521 = vmatpush3.msra.mxu0 %v282_v36 }
  0x5b   :  { %522 = vmatprep.subr.mxu0 %v678_v0 }
  0x5c   :  { %523 = vmatpush3.msra.mxu0 %v281_v37 }
  0x5d   :  { %524 = vmatprep.subr.mxu0 %v678_v0 }
  0x5e   :  { %525 = vmatpush3.msra.mxu0 %v280_v38 }
  0x5f   :  { %526 = vmatprep.subr.mxu0 %v678_v0 }
  0x60   :  { %527 = vmatpush3.msra.mxu0 %v279_v39 }
  0x61   :  { %528 = vmatprep.subr.mxu0 %v678_v0 }
  0x62   :  { %529 = vmatpush3.msra.mxu0 %v278_v40 }
  0x63   :  { %530 = vmatprep.subr.mxu0 %v678_v0 }
  0x64   :  { %531 = vmatpush3.msra.mxu0 %v277_v41 }
  0x65   :  { %532 = vmatprep.subr.mxu0 %v678_v0 }
  0x66   :  { %533 = vmatpush3.msra.mxu0 %v276_v42 }
  0x67   :  { %534 = vmatprep.subr.mxu0 %v678_v0 }
  0x68   :  { %535 = vmatpush3.msra.mxu0 %v275_v43 }
  0x69   :  { %536 = vmatprep.subr.mxu0 %v678_v0 }
  0x6a   :  { %537 = vmatpush3.msra.mxu0 %v274_v44 }
  0x6b   :  { %538 = vmatprep.subr.mxu0 %v678_v0 }
  0x6c   :  { %539 = vmatpush3.msra.mxu0 %v273_v45 }
  0x6d   :  { %540 = vmatprep.subr.mxu0 %v678_v0 }
  0x6e   :  { %541 = vmatpush3.msra.mxu0 %v272_v46 }
  0x6f   :  { %542 = vmatprep.subr.mxu0 %v678_v0 }
  0x70   :  { %543 = vmatpush3.msra.mxu0 %v271_v52 }
  0x71   :  { %544 = vmatprep.subr.mxu0 %v678_v0 }
  0x72   :  { %545 = vmatpush3.msra.mxu0 %v270_v53 }
  0x73   :  { %546 = vmatprep.subr.mxu0 %v678_v0 }
  0x74   :  { %547 = vmatpush3.msra.mxu0 %v269_v54 }
 0x115   :  { %v170_v48 = vpop.f32.mrf.mxu0 }
 0x116   :  { %v171_v49 = vadd.f32 %v392_v47, %v170_v48 }
 0x117   :  { %v480_v50 = vpop.f32.mrf.mxu0 }
 0x118   :  { %v174_v51 = vmax.f32 %v171_v49, 0.0 }
 0x11a   :  { %514 = vmatmul.mubr.f32.vlgmr.msra.gmra.mxu1 %v174_v51 }
 0x1da   :  { %v264_v56 = vpop.f32.mrf.mxu1 }
 0x1db   :  { %v265_v57 = vadd.f32 %v393_v55, %v264_v56 }
 0x1dc   :  { %v515_v58 = vpop.f32.mrf.mxu1 }
 0x1dd   :  { %v268_v59 = vmax.f32 %v265_v57, 0.0 }
 0x1df   :  { %549 = vmatmul.mubr.f32.vlgmr.msra.gmra.mxu0 %v268_v59 }
 0x29f   :  { %v358_v61 = vpop.f32.mrf.mxu0 }
 0x2a0   :  { %v359_v62 = vadd.f32 %v394_v60, %v358_v61 }
 0x2a1   :  { %v550_v63 = vpop.f32.mrf.mxu0 }
 0x2a2   :  { %362 = vmax.xlane.f32.xlu0 %v359_v62 }
 0x32b   :  { %v363_v0 = vpop.xlane.xlu0 %362 }
 0x32c   :  { %v364_v1 = vsub.f32 %v359_v62, %v363_v0 }
 0x32e   :  { %v365_v2 = vmul.f32 1.442695, %v364_v1 }
 0x330   :  { %560 = vpow2.f32 %v365_v2 }
 0x33d   :  { %v561_v3 = vpop.eup %560 }
 0x33e   :  { %367 = vadd.xlane.f32.xlu0 %v561_v3 }
 0x3c7   :  { %v368_v4 = vpop.xlane.xlu0 %367 }
 0x3c8   :  { %562 = vrcp.f32 %v368_v4 }
 0x3d5   :  { %v563_v5 = vpop.eup %562 }
 0x3d6   :  { %v370_v6 = vmul.f32 %v563_v5, %v368_v4 }
 0x3d8   :  { %v371_v7 = vsub.f32 2.0, %v370_v6 }
 0x3da   :  { %v372_v8 = vmul.f32 %v563_v5, %v371_v7 }
 0x3dc   :  { %v373_v9 = vmul.f32 %v561_v3, %v372_v8 }
 0x3de   :  { %374 = vst [vmem:[#allocation10] sm:$0xff] %v373_v9 }
 0x3df   :  { %655 = shalt.err (!%p652_p10)
}
 0x3e0   :  { %384 = dma.vmem_to_hbm [thread:$0]  %s382_s24, 128, %s815_s7, [#allocation4]  }
 0x3e1   :  { %670 = dma.done.wait [#allocation4], 128  }
 0x3e2   :  { %671 = vsyncadd [#allocation4], 4294967168 }
 0x3e3   :  { %388 = vsyncpa [#allocation3], 1 }
 0x3e4   :  { %389 = vsyncpa [#allocation6], 1 }
 0x3e5   :  { %390 = vsyncpa [#allocation9], 1 }
 0x3e6   :  { %391 = vsyncpa [#allocation4], 1 }

</bundles_post_ra>
